<compile_context>
chip_gen: v7x
topology: tpu7x:2x2x1
jax: 0.10.0
libtpu: 0.0.40
codegen_flags: <defaults>
</compile_context>

<pallas_src>
import jax
import jax.numpy as jnp
from jax.experimental import pallas as pl
from jax.experimental.pallas import tpu as pltpu


def se_block_kernel(x_ref, w1t_ref, w2t_ref, o_ref):
    # x_ref : (TB, C, H)   TB batch rows, full channel/sequence extents
    # w1t_ref: (C, HID)    first Linear weight, pre-transposed
    # w2t_ref: (HID, C)    second Linear weight, pre-transposed
    # o_ref : (TB, C, H)
    xb = x_ref[...]                                              # single tile read

    # Squeeze: global average pool over the sequence axis (f32 accumulation).
    pooled = jnp.mean(xb.astype(jnp.float32), axis=-1)           # (TB, C)

    # Excitation: batched bias-free linears on the MXU.
    hmid = jnp.dot(pooled, w1t_ref[...],
                   preferred_element_type=jnp.float32)           # (TB, HID)
    hmid = jnp.maximum(hmid, 0.0)                                # ReLU
    gate = jnp.dot(hmid, w2t_ref[...],
                   preferred_element_type=jnp.float32)           # (TB, C)
    gate = jax.nn.sigmoid(gate)                                  # Sigmoid

    # Scale: cast the small gate down (not the big tile up) and store once.
    o_ref[...] = xb * gate.astype(xb.dtype)[:, :, None]


def _pick_batch_tile(b, c, h, itemsize, tile_cap_bytes):
    """Largest divisor of b whose (TB, C, H) tile fits the cap, preferring grid >= 2."""
    per_row = c * h * itemsize
    divisors = [d for d in range(1, b + 1)
                if b % d == 0 and d * per_row <= tile_cap_bytes]
    if not divisors:
        # A single row already exceeds the cap; we still need full (C, H) because
        # pooling and scaling are fused (see TODO(synk) above).
        return 1
    multi_step = [d for d in divisors if b // d >= 2]
    return max(multi_step) if multi_step else max(divisors)


def se_block(x, w1, w2, *,
             tile_cap_bytes=8 * 1024 * 1024,
             vmem_limit_bytes=48 * 1024 * 1024):
    """x: (b, c, h); w1: (c//r, c); w2: (c, c//r) (PyTorch nn.Linear layouts)."""
    b, c, h = x.shape
    hid = w1.shape[0]
    assert w1.shape == (hid, c) and w2.shape == (c, hid)

    # Pre-transpose the (tiny) weights wrapper-side: no in-kernel transpose.
    w1t = w1.T  # (c, hid)
    w2t = w2.T  # (hid, c)

    tb = _pick_batch_tile(b, c, h, jnp.dtype(x.dtype).itemsize, tile_cap_bytes)
    grid = (b // tb,)

    return pl.pallas_call(
        se_block_kernel,
        out_shape=jax.ShapeDtypeStruct((b, c, h), x.dtype),
        grid_spec=pltpu.PrefetchScalarGridSpec(
            num_scalar_prefetch=0,
            grid=grid,
            in_specs=[
                pl.BlockSpec((tb, c, h), lambda i: (i, 0, 0)),
                # Constant index_map: weights are fetched once, never re-DMA'd.
                pl.BlockSpec((c, hid), lambda i: (0, 0)),
                pl.BlockSpec((hid, c), lambda i: (0, 0)),
            ],
            out_specs=pl.BlockSpec((tb, c, h), lambda i: (i, 0, 0)),
        ),
        compiler_params=pltpu.CompilerParams(
            dimension_semantics=("parallel",),
            vmem_limit_bytes=vmem_limit_bytes,
        ),
    )(x, w1t, w2t)


def se_block_ref(x, w1, w2):
    y = jnp.mean(x, axis=-1)                 # (b, c)
    y = jnp.maximum(y @ w1.T, 0.0)           # (b, hid)
    y = jax.nn.sigmoid(y @ w2.T)             # (b, c)
    return x * y[..., None]


if __name__ == "__main__":
    # Small shapes consistent with the module: Linear(c, c//ratio) needs
    # c divisible by ratio=16. B=4 exercises TB=2 batching with a grid of 2.
    B, C, H, RATIO = 4, 32, 16, 16
    HID = C // RATIO

    key = jax.random.PRNGKey(0)
    kx, k1, k2 = jax.random.split(key, 3)
    x = jax.random.normal(kx, (B, C, H), dtype=jnp.float32)
    # Deterministic parameter init (shapes match nn.Linear weights).
    w1 = jax.random.normal(k1, (HID, C), dtype=jnp.float32) * 0.1
    w2 = jax.random.normal(k2, (C, HID), dtype=jnp.float32) * 0.1

    out = se_block(x, w1, w2)
    out = jax.block_until_ready(out)

    ref = se_block_ref(x, w1, w2)
    assert out.shape == (B, C, H)
    assert jnp.allclose(out, ref, atol=1e-5, rtol=1e-5), "mismatch vs reference"

    print("KERNEL_OK")
</pallas_src>

<mosaic_0001>
module attributes {stable_mosaic.version = 11 : i64} {
  func.func @se_block_kernel(%arg0: i32, %arg1: memref<2x32x16xf32, #tpu.memory_space<vmem>>, %arg2: memref<32x2xf32, #tpu.memory_space<vmem>>, %arg3: memref<2x32xf32, #tpu.memory_space<vmem>>, %arg4: memref<2x32x16xf32, #tpu.memory_space<vmem>>) attributes {dimension_semantics = [#tpu.dimension_semantics<parallel>], iteration_bounds = array<i64: 2>, scalar_prefetch = 0 : i64, scratch_operands = 0 : i64, tpu.core_type = #tpu.core_type<tc>, window_params = [{transform_indices = @transform_0, window_bounds = array<i64: 2, 32, 16>}, {pipeline_mode = #tpu.pipeline_mode<synchronous>, transform_indices = @transform_1, window_bounds = array<i64: 32, 2>}, {pipeline_mode = #tpu.pipeline_mode<synchronous>, transform_indices = @transform_2, window_bounds = array<i64: 2, 32>}, {transform_indices = @transform_3, window_bounds = array<i64: 2, 32, 16>}]} {
    %c0 = arith.constant 0 : index
    %c0_0 = arith.constant 0 : index
    %c0_1 = arith.constant 0 : index
    %0 = vector.load %arg1[%c0, %c0_0, %c0_1] : memref<2x32x16xf32, #tpu.memory_space<vmem>>, vector<2x32x16xf32>
    %cst = arith.constant dense<0.000000e+00> : vector<2x32xf32>
    %1 = vector.multi_reduction <add>, %0, %cst [2] : vector<2x32x16xf32> to vector<2x32xf32>
    %cst_2 = arith.constant 1.600000e+01 : f32
    %2 = vector.broadcast %cst_2 : f32 to vector<2x32xf32>
    %3 = arith.divf %1, %2 : vector<2x32xf32>
    %c0_3 = arith.constant 0 : index
    %c0_4 = arith.constant 0 : index
    %4 = vector.load %arg2[%c0_3, %c0_4] : memref<32x2xf32, #tpu.memory_space<vmem>>, vector<32x2xf32>
    %cst_5 = arith.constant dense<0.000000e+00> : vector<2x2xf32>
    %5 = tpu.matmul %3, %4, %cst_5 {dimension_numbers = #tpu.dot_dimension_numbers<[1], [0], [0], [1], [0, 0, 1, 1], [], []>} : vector<2x32xf32>, vector<32x2xf32>, vector<2x2xf32> -> vector<2x2xf32>
    %cst_6 = arith.constant 0.000000e+00 : f32
    %6 = vector.broadcast %cst_6 : f32 to vector<2x2xf32>
    %7 = arith.maximumf %5, %6 : vector<2x2xf32>
    %c0_7 = arith.constant 0 : index
    %c0_8 = arith.constant 0 : index
    %8 = vector.load %arg3[%c0_7, %c0_8] : memref<2x32xf32, #tpu.memory_space<vmem>>, vector<2x32xf32>
    %cst_9 = arith.constant dense<0.000000e+00> : vector<2x32xf32>
    %9 = tpu.matmul %7, %8, %cst_9 {dimension_numbers = #tpu.dot_dimension_numbers<[1], [0], [0], [1], [0, 0, 1, 1], [], []>} : vector<2x2xf32>, vector<2x32xf32>, vector<2x32xf32> -> vector<2x32xf32>
    %10 = arith.negf %9 : vector<2x32xf32>
    %11 = math.exp %10 : vector<2x32xf32>
    %cst_10 = arith.constant 1.000000e+00 : f32
    %12 = vector.broadcast %cst_10 : f32 to vector<2x32xf32>
    %13 = arith.addf %12, %11 : vector<2x32xf32>
    %14 = arith.divf %12, %13 : vector<2x32xf32>
    %15 = vector.shape_cast %14 : vector<2x32xf32> to vector<2x32x1xf32>
    %16 = vector.broadcast %15 : vector<2x32x1xf32> to vector<2x32x16xf32>
    %17 = arith.mulf %0, %16 : vector<2x32x16xf32>
    %c0_11 = arith.constant 0 : index
    %c0_12 = arith.constant 0 : index
    %c0_13 = arith.constant 0 : index
    %18 = vector.load %arg4[%c0_11, %c0_12, %c0_13] : memref<2x32x16xf32, #tpu.memory_space<vmem>>, vector<2x32x16xf32>
    tpu.vector_store %arg4[%c0_11, %c0_12, %c0_13], %17 {strides = array<i32>} : memref<2x32x16xf32, #tpu.memory_space<vmem>>, vector<2x32x16xf32>,
    return
  }
  func.func @transform_0(%arg0: i32) -> (i32, i32, i32) {
    %c0_i32 = arith.constant 0 : i32
    %c0_i32_0 = arith.constant 0 : i32
    %c0_i32_1 = arith.constant 0 : i32
    return %arg0, %c0_i32, %c0_i32_0 : i32, i32, i32
  }
  func.func @transform_1(%arg0: i32) -> (i32, i32) {
    %c0_i32 = arith.constant 0 : i32
    %c0_i32_0 = arith.constant 0 : i32
    %c0_i32_1 = arith.constant 0 : i32
    return %c0_i32, %c0_i32_0 : i32, i32
  }
  func.func @transform_2(%arg0: i32) -> (i32, i32) {
    %c0_i32 = arith.constant 0 : i32
    %c0_i32_0 = arith.constant 0 : i32
    %c0_i32_1 = arith.constant 0 : i32
    return %c0_i32, %c0_i32_0 : i32, i32
  }
  func.func @transform_3(%arg0: i32) -> (i32, i32, i32) {
    %c0_i32 = arith.constant 0 : i32
    %c0_i32_0 = arith.constant 0 : i32
    %c0_i32_1 = arith.constant 0 : i32
    return %arg0, %c0_i32, %c0_i32_0 : i32, i32, i32
  }
}

</mosaic_0001>

<bundles_post_ra>
// kernel: tpu_custom_call.1
= control target key start
LH: loop header
LB: loop body
LE: loop exit
PB: predicated region body
PF: predicated region fallthrough
CT: control target
= control target key end

     0   :  { %s646_s12 = smov 0   ;;  %s743_s0 = inlined_call_operand.vmem [shape: f32[4,32,16], index: 0, kind: input, shape index: {}]   ;;  %s744_s1 = inlined_call_operand.vmem [shape: f32[32,2], index: 1, kind: input, shape index: {}]   ;;  %s745_s2 = inlined_call_operand.vmem [shape: f32[2,32], index: 2, kind: input, shape index: {}]   ;;  %s746_s3 = inlined_call_operand.vmem [shape: f32[4,32,16], index: 3, kind: output, shape index: {}]  }
   0x1 LB: > { %s552_s13 = sadd.s32 4294967295, %s621_s12   ;;  %p556_p0 = scmp.ge.s32.totalorder %s621_s12, 1  ;;  %s621_s12 = sphi %s646_s12, %s13_s12  }
   0x2   : > { %p139_p1 = scmp.lt.s32.totalorder %s621_s12, 3 }
   0x4   : > { %p140_p2 = pnand %p556_p0, %p139_p1 }
   0x5   : > { %s557_s14 = sshll.u32 (!%p140_p2), %s552_s13, 1  ;;  %vm187_vm0 = vcmask (!%p140_p2), 130048   ;;  %v221_v16 = vld [vmem:[%s744_s1] sm:$0xff] (!%p140_p2)  ;;  %v222_v17 = vld [vmem:[%s744_s1 + $0x8] sm:$0xff] (!%p140_p2)  ;;  %v623_v19 = vmov (!%p140_p2), 0.0|0.0   ;;  %v223_v20 = vld [vmem:[%s744_s1 + $0x10] sm:$0xff] (!%p140_p2)  ;;  %v233_v24 = vlaneseq (!%p140_p2) }
   0x6   : > { %143 = sbr.rel (%p140_p2) target bundleno = 767 (0x2ff), region = 32  ;;  %p166_p3 = scmp.lt.s32.totalorder (!%p140_p2), %s557_s14, 3  ;;  %v595_v18 = vpack.c.bf16 (!%p140_p2), %v222_v17, %v221_v16  ;;  %594 = vmatprep.subr.bf16.mxu0 (!%p140_p2), %v623_v19  ;;  %v224_v21 = vld [vmem:[%s744_s1 + $0x18] sm:$0xff] (!%p140_p2)  ;;  %vm624_vm1 = vmmov (!%p140_p2), 0   ;;  %v625_v23 = vmov (!%p140_p2), 0.0   ;;  %vm244_vm2 = vcmask (!%p140_p2), 130112  }
   0x7   : > { %v598_v22 = vpack.c.bf16 (!%p140_p2), %v224_v21, %v223_v20  ;;  %586 = vmatprep.mubr.msk.f32.mxu0 (!%p140_p2), %vm624_vm1, %v625_v23  ;;  %589 = vmatprep.subr.mxu1 (!%p140_p2), %v625_v23  ;;  %v234_v27 = vand.u32 (!%p140_p2), 127, %v233_v24  ;;  %v706_v29 = vshrl.u32 (!%p140_p2), %v233_v24, 7  ;;  %vm251_vm3 = vcmask (!%p140_p2), 195712  }
   0x8   : > { %596 = vmatpush3.bf16.msra.mxu0 (!%p140_p2), %v595_v18  ;;  %591 = vmatprep.mubr.msk.f32.mxu1 (!%p140_p2), %vm624_vm1, %v625_v23  ;;  %vm258_vm4 = vcmask (!%p140_p2), 261312   ;;  %vm279_vm5 = vcmask (!%p140_p2), 1041409   ;;  %vm281_vm6 = vcmask (!%p140_p2), 261120   ;;  %vm360_vm7 = vcmask (!%p140_p2), 1041408  }
   0x9   : > { %597 = vmatprep.subr.bf16.mxu0 (!%p140_p2), %v623_v19  ;;  %v239_v28 = vadd.s32 (!%p140_p2), 4294967288, %v234_v27  ;;  %v246_v32 = vadd.s32 (!%p140_p2), 4294967280, %v234_v27  ;;  %v253_v36 = vadd.s32 (!%p140_p2), 4294967272, %v234_v27  ;;  %v237_v37 = vsub.s32 (!%p140_p2), %v234_v27, %v706_v29 }
   0xa   : > { %vm356_vm8 = vcmask (!%p140_p2), 15360   ;;  %v442_v18 = vsub.s32 (!%p140_p2), 0, %v706_v29  ;;  %v461_v21 = vsub.s32 (!%p140_p2), 1, %v706_v29 }
   0xb   : > { %v242_v33 = vsub.s32 (!%p140_p2), %v239_v28, %v706_v29  ;;  %v249_v38 = vsub.s32 (!%p140_p2), %v246_v32, %v706_v29  ;;  %v256_v47 = vsub.s32 (!%p140_p2), %v253_v36, %v706_v29 }
   0xc   : > { %599 = vmatpush3.bf16.msra.mxu0 (!%p140_p2), %v598_v22 }
   0xd   : > { %s748_s14 = smov (!%p166_p3, %s557_s14), 3 }
   0xe   : > { %s569_s15 = sshll.u32 %s748_s14, 5 }
   0xf   : > { %s170_s18 = scalar_lea.vmem %s743_s0, %s569_s15  ;;  %s177_s4 = scalar_lea.vmem %s746_s3, %s569_s15 }
  0x10   : > { %v662_v0 = vld [vmem:[%s170_s18 + $0x20] sm:$0xff]  ;;  %v666_v2 = vld [vmem:[%s170_s18 + $0x28] sm:$0xff]  ;;  %v678_v8 = vld [vmem:[%s170_s18 + $0x30] sm:$0xff] }
  0x11   : > { %v664_v1 = vld [vmem:[%s170_s18] sm:$0xff]  ;;  %v200_v3 = vsel %vm187_vm0, %v662_v0, 0.0  ;;  %v672_v5 = vld [vmem:[%s170_s18 + $0x8] sm:$0xff]  ;;  %v203_v6 = vsel %vm187_vm0, %v666_v2, 0.0  ;;  %v680_v9 = vld [vmem:[%s170_s18 + $0x10] sm:$0xff]  ;;  %v206_v10 = vsel %vm187_vm0, %v678_v8, 0.0 }
  0x12   : > { %v188_v4 = vsel %vm187_vm0, %v664_v1, 0.0  ;;  %201 = vadd.xlane.f32.xlu1 %v200_v3  ;;  %v191_v7 = vsel %vm187_vm0, %v672_v5, 0.0  ;;  %v194_v11 = vsel %vm187_vm0, %v680_v9, 0.0  ;;  %v686_v12 = vld [vmem:[%s170_s18 + $0x38] sm:$0xff] }
  0x13   : > { %189 = vadd.xlane.f32.xlu0 %v188_v4  ;;  %v688_v13 = vld [vmem:[%s170_s18 + $0x18] sm:$0xff]  ;;  %v209_v14 = vsel %vm187_vm0, %v686_v12, 0.0  ;;  %v355_v4 = vld [vmem:[%s745_s2] sm:$0x3] }
  0x14   : > { %v197_v15 = vsel %vm187_vm0, %v688_v13, 0.0  ;;  %590 = vmatpush3.msk.msra.mxu1 %vm360_vm7, %v355_v4 }
  0x16   : > { %204 = vadd.xlane.f32.xlu1 %v203_v6 }
  0x17   : > { %192 = vadd.xlane.f32.xlu0 %v191_v7 }
  0x1a   : > { %207 = vadd.xlane.f32.xlu1 %v206_v10 }
  0x1b   : > { %195 = vadd.xlane.f32.xlu0 %v194_v11 }
  0x1e   : > { %210 = vadd.xlane.f32.xlu1 %v209_v14 }
  0x1f   : > { %198 = vadd.xlane.f32.xlu0 %v197_v15 }
  0x9f   : > { %v202_v25 = vpop.xlane.xlu1 %201 }
  0xa0   : > { %v190_v26 = vpop.xlane.xlu0 %189  ;;  %v217_v41 = vmul.f32 0.0625, %v202_v25 }
  0xa1   : > { %v213_v42 = vmul.f32 0.0625, %v190_v26 }
  0xa2   : > { %v263_v52 = vrot.slane %v217_v41, %v237_v37 }
  0xa3   : > { %v205_v30 = vpop.xlane.xlu1 %204  ;;  %v238_v53 = vrot.slane %v213_v42, %v237_v37 }
  0xa4   : > { %v193_v31 = vpop.xlane.xlu0 %192  ;;  %v218_v34 = vmul.f32 0.0625, %v205_v30 }
  0xa5   : > { %v214_v35 = vmul.f32 0.0625, %v193_v31 }
  0xa6   : > { %v267_v45 = vrot.slane %v218_v34, %v242_v33 }
  0xa7   : > { %v208_v39 = vpop.xlane.xlu1 %207  ;;  %v243_v46 = vrot.slane %v214_v35, %v242_v33 }
  0xa8   : > { %v196_v40 = vpop.xlane.xlu0 %195  ;;  %v219_v43 = vmul.f32 0.0625, %v208_v39  ;;  %v268_v56 = vsel %vm244_vm2, %v267_v45, %v263_v52 }
  0xa9   : > { %v215_v44 = vmul.f32 0.0625, %v196_v40  ;;  %v245_v57 = vsel %vm244_vm2, %v243_v46, %v238_v53 }
  0xaa   : > { %v272_v48 = vrot.slane %v219_v43, %v249_v38 }
  0xab   : > { %v250_v49 = vrot.slane %v215_v44, %v249_v38  ;;  %v211_v50 = vpop.xlane.xlu1 %210 }
  0xac   : > { %v199_v51 = vpop.xlane.xlu0 %198  ;;  %v220_v54 = vmul.f32 0.0625, %v211_v50  ;;  %v273_v60 = vsel %vm251_vm3, %v272_v48, %v268_v56 }
  0xad   : > { %v216_v55 = vmul.f32 0.0625, %v199_v51  ;;  %v252_v61 = vsel %vm251_vm3, %v250_v49, %v245_v57 }
  0xae   : > { %v277_v58 = vrot.slane %v220_v54, %v256_v47 }
  0xaf   : > { %v257_v59 = vrot.slane %v216_v55, %v256_v47 }
  0xb0   : > { %v278_v63 = vsel %vm258_vm4, %v277_v58, %v273_v60 }
  0xb1   : > { %v259_v62 = vsel %vm258_vm4, %v257_v59, %v252_v61 }
  0xb2   : > { %v280_v3 = vsel %vm279_vm5, %v278_v63, %v259_v62 }
  0xb3   : > { %587 = vmatmul.mubr.msk.f32.vlgmr.msra.gmra.mrb[0].mxu0 %vm281_vm6, %v280_v3 }
 0x186   : > { %v350_v6 = vpop.f32.mrb[0].mxu0 }
 0x187   : > { %v354_v7 = vmax.f32 %v350_v6, 0.0  ;;  %v588_v10 = vpop.f32.mrb[1].mxu0 }
 0x189   : > { %592 = vmatmul.mubr.msk.f32.vlgmr.msra.gmra.mrb[0].mxu1 %vm356_vm8, %v354_v7 }
 0x25c   : > { %v430_v11 = vpop.f32.mrb[0].mxu1 }
 0x25d   : > { %v566_v14 = vmul.f32 -1.442695, %v430_v11  ;;  %v593_v15 = vpop.f32.mrb[1].mxu1 }
 0x25f   : > { %611 = vpow2.f32 %v566_v14 }
 0x269   : > { %v612_v16 = vpop.eup %611 }
 0x26a   : > { %v437_v17 = vadd.f32 1.0, %v612_v16 }
 0x26c   : > { %613 = vrcp.f32 %v437_v17 }
 0x276   : > { %v614_v19 = vpop.eup %613 }
 0x277   : > { %v443_v20 = vrot.slane %v614_v19, %v442_v18  ;;  %v462_v22 = vrot.slane %v614_v19, %v461_v21 }
 0x279   : > { %449 = vbcast.lane.b32.xlu1 %v443_v20, 264  ;;  %445 = vbcast.lane.b32.xlu0 %v443_v20, 256 }
 0x27d   : > { %453 = vbcast.lane.b32.xlu1 %v443_v20, 272  ;;  %464 = vbcast.lane.b32.xlu0 %v462_v22, 256 }
 0x281   : > { %457 = vbcast.lane.b32.xlu1 %v443_v20, 280  ;;  %472 = vbcast.lane.b32.xlu0 %v462_v22, 272 }
 0x285   : > { %468 = vbcast.lane.b32.xlu1 %v462_v22, 264 }
 0x289   : > { %476 = vbcast.lane.b32.xlu1 %v462_v22, 280 }
 0x2eb   : > { %v450_v23 = vpop.permute.xlu1 %449  ;;  %v446_v24 = vpop.permute.xlu0 %445 }
 0x2ec   : > { %v479_v25 = vmul.f32 %v450_v23, %v672_v5  ;;  %v478_v26 = vmul.f32 %v446_v24, %v664_v1 }
 0x2ee   : > { %487 = vst.msk [vmem:[%s177_s4 + $0x8] sm:$0xff] %vm187_vm0, %v479_v25  ;;  %486 = vst.msk [vmem:[%s177_s4] sm:$0xff] %vm187_vm0, %v478_v26 }
 0x2ef   : > { %v454_v27 = vpop.permute.xlu1 %453  ;;  %v465_v28 = vpop.permute.xlu0 %464 }
 0x2f0   : > { %v480_v29 = vmul.f32 %v454_v27, %v680_v9  ;;  %v482_v30 = vmul.f32 %v465_v28, %v662_v0 }
 0x2f2   : > { %488 = vst.msk [vmem:[%s177_s4 + $0x10] sm:$0xff] %vm187_vm0, %v480_v29  ;;  %490 = vst.msk [vmem:[%s177_s4 + $0x20] sm:$0xff] %vm187_vm0, %v482_v30 }
 0x2f3   : > { %v458_v31 = vpop.permute.xlu1 %457  ;;  %v473_v32 = vpop.permute.xlu0 %472 }
 0x2f4   : > { %v481_v5 = vmul.f32 %v458_v31, %v688_v13  ;;  %v484_v1 = vmul.f32 %v473_v32, %v678_v8 }
 0x2f6   : > { %489 = vst.msk [vmem:[%s177_s4 + $0x18] sm:$0xff] %vm187_vm0, %v481_v5  ;;  %492 = vst.msk [vmem:[%s177_s4 + $0x30] sm:$0xff] %vm187_vm0, %v484_v1 }
 0x2f7   : > { %v469_v33 = vpop.permute.xlu1 %468 }
 0x2f8   : > { %v483_v34 = vmul.f32 %v469_v33, %v666_v2 }
 0x2fa   : > { %491 = vst.msk [vmem:[%s177_s4 + $0x28] sm:$0xff] %vm187_vm0, %v483_v34 }
 0x2fb   : > { %v477_v0 = vpop.permute.xlu1 %476 }
 0x2fc   : > { %v485_v9 = vmul.f32 %v477_v0, %v686_v12 }
 0x2fe   : > { %493 = vst.msk [vmem:[%s177_s4 + $0x38] sm:$0xff] %vm187_vm0, %v485_v9 }
 0x2ff PF: > { %s13_s12 = sadd.s32 1, %s621_s12  }
 0x300   : > { %p10_p4 = scmp.ge.s32.totalorder %s13_s12, 4  }
 0x302   :  { %12 = sbr.rel (!%p10_p4) target bundleno = 1 (0x1), region = 62 }

</bundles_post_ra>
